<compile_context>
chip_gen: v7x
topology: tpu7x:2x2x1
jax: 0.10.0
libtpu: 0.0.40
codegen_flags: <defaults>
</compile_context>

<pallas_src>
import functools

import jax
import jax.numpy as jnp
from jax import lax
from jax.experimental import pallas as pl
from jax.experimental.pallas import tpu as pltpu


def _make_gap_kernel(tr, tl, hw):
    """Kernel reducing (tr, tl) input tiles of a (rows, hw) array over axis 1."""
    inv_area = 1.0 / float(hw)
    needs_col_mask = (hw % tl) != 0  # last column block is partial

    def kernel(x_ref, o_ref, acc_ref):
        ci = pl.program_id(1)

        @pl.when(ci == 0)
        def _():
            acc_ref[...] = jnp.zeros_like(acc_ref)

        x = x_ref[...].astype(jnp.float32)
        if needs_col_mask:
            col = ci * tl + lax.broadcasted_iota(jnp.int32, (tr, tl), 1)
            x = jnp.where(col < hw, x, 0.0)
        acc_ref[...] += jnp.sum(x, axis=1, keepdims=True)

        @pl.when(ci == pl.num_programs(1) - 1)
        def _():
            o_ref[...] = (acc_ref[...] * inv_area).astype(o_ref.dtype)

    return kernel


@jax.jit
def global_avg_pool2d(x):
    """Forward pass of GlobalAvgPool2d on an NCHW tensor.

    Equivalent to nn.AdaptiveAvgPool2d(1): output shape (N, C, 1, 1).
    """
    n, c, h, w = x.shape
    rows = n * c
    hw = h * w

    # Free, contiguous views (no HBM round trip).
    x2 = x.reshape(rows, hw)

    # Row tile: full extent if small, else a multiple of 8.
    tr = rows if rows <= 512 else 512
    # Column (lane) tile: full extent if small, else a 128-multiple chunk
    # (~2 MiB/buffer in f32 at tr=512, tl=2048 -> safe on all generations).
    tl = hw if hw <= 2048 else 2048

    grid = (pl.cdiv(rows, tr), pl.cdiv(hw, tl))

    out2 = pl.pallas_call(
        _make_gap_kernel(tr, tl, hw),
        out_shape=jax.ShapeDtypeStruct((rows, 1), x.dtype),
        grid=grid,
        in_specs=[pl.BlockSpec((tr, tl), lambda r, ci: (r, ci))],
        out_specs=pl.BlockSpec((tr, 1), lambda r, ci: (r, 0)),
        scratch_shapes=[pltpu.VMEM((tr, 1), jnp.float32)],
        compiler_params=pltpu.CompilerParams(
            dimension_semantics=("parallel", "arbitrary")),
    )(x2)

    return out2.reshape(n, c, 1, 1)


def _reference_global_avg_pool2d(x):
    return jnp.mean(x, axis=(2, 3), keepdims=True)


if __name__ == "__main__":
    key = jax.random.PRNGKey(0)

    # Case 1: the module's canonical small shape.
    x1 = jax.random.normal(key, (2, 4, 16, 16), dtype=jnp.float32)
    out1 = global_avg_pool2d(x1)
    jax.block_until_ready(out1)
    assert out1.shape == (2, 4, 1, 1), out1.shape
    assert jnp.allclose(out1, _reference_global_avg_pool2d(x1),
                        atol=1e-5, rtol=1e-5)

    # Case 2: spatial size not a multiple of 128 lanes (full-extent lane block).
    k2 = jax.random.PRNGKey(1)
    x2 = jax.random.normal(k2, (2, 4, 7, 7), dtype=jnp.float32)
    out2 = global_avg_pool2d(x2)
    jax.block_until_ready(out2)
    assert out2.shape == (2, 4, 1, 1), out2.shape
    assert jnp.allclose(out2, _reference_global_avg_pool2d(x2),
                        atol=1e-5, rtol=1e-5)

    # Case 3: spatial size large enough to exercise the column-tiled
    # accumulator path with a partial (masked) last block.
    k3 = jax.random.PRNGKey(2)
    x3 = jax.random.normal(k3, (1, 8, 65, 33), dtype=jnp.float32)  # hw = 2145 > 2048
    out3 = global_avg_pool2d(x3)
    jax.block_until_ready(out3)
    assert out3.shape == (1, 8, 1, 1), out3.shape
    assert jnp.allclose(out3, _reference_global_avg_pool2d(x3),
                        atol=1e-5, rtol=1e-5)

    print("KERNEL_OK")
</pallas_src>

<mosaic_0001>
module attributes {stable_mosaic.version = 11 : i64} {
  func.func @kernel(%arg0: i32, %arg1: i32, %arg2: memref<8x256xf32, #tpu.memory_space<vmem>>, %arg3: memref<8x1xf32, #tpu.memory_space<vmem>>, %arg4: memref<8x1xf32, #tpu.memory_space<vmem>>) attributes {dimension_semantics = [#tpu.dimension_semantics<parallel>, #tpu.dimension_semantics<arbitrary>], iteration_bounds = array<i64: 1, 1>, scalar_prefetch = 0 : i64, scratch_operands = 1 : i64, tpu.core_type = #tpu.core_type<tc>, window_params = [{transform_indices = @transform_0, window_bounds = array<i64: 8, 256>}, {transform_indices = @transform_1, window_bounds = array<i64: 8, 1>}]} {
    %c0_i32 = arith.constant 0 : i32
    %0 = arith.cmpi eq, %arg1, %c0_i32 : i32
    %1 = arith.extui %0 : i1 to i32
    %c0_i32_0 = arith.constant 0 : i32
    %2 = arith.cmpi ne, %1, %c0_i32_0 : i32
    scf.if %2 {
      %cst_8 = arith.constant 0.000000e+00 : f32
      %12 = vector.broadcast %cst_8 : f32 to vector<8x1xf32>
      %c0_9 = arith.constant 0 : index
      %c0_10 = arith.constant 0 : index
      %13 = vector.load %arg4[%c0_9, %c0_10] : memref<8x1xf32, #tpu.memory_space<vmem>>, vector<8x1xf32>
      tpu.vector_store %arg4[%c0_9, %c0_10], %12 {strides = array<i32>} : memref<8x1xf32, #tpu.memory_space<vmem>>, vector<8x1xf32>,
    } else {
    }
    %c0 = arith.constant 0 : index
    %c0_1 = arith.constant 0 : index
    %3 = vector.load %arg2[%c0, %c0_1] : memref<8x256xf32, #tpu.memory_space<vmem>>, vector<8x256xf32>
    %c0_2 = arith.constant 0 : index
    %c0_3 = arith.constant 0 : index
    %4 = vector.load %arg4[%c0_2, %c0_3] : memref<8x1xf32, #tpu.memory_space<vmem>>, vector<8x1xf32>
    %cst = arith.constant dense<0.000000e+00> : vector<8xf32>
    %5 = vector.multi_reduction <add>, %3, %cst [1] : vector<8x256xf32> to vector<8xf32>
    %6 = vector.shape_cast %5 : vector<8xf32> to vector<8x1xf32>
    %7 = arith.addf %4, %6 : vector<8x1xf32>
    %c0_4 = arith.constant 0 : index
    %c0_5 = arith.constant 0 : index
    %8 = vector.load %arg4[%c0_4, %c0_5] : memref<8x1xf32, #tpu.memory_space<vmem>>, vector<8x1xf32>
    tpu.vector_store %arg4[%c0_4, %c0_5], %7 {strides = array<i32>} : memref<8x1xf32, #tpu.memory_space<vmem>>, vector<8x1xf32>,
    %c0_i32_6 = arith.constant 0 : i32
    %9 = arith.cmpi eq, %arg1, %c0_i32_6 : i32
    %10 = arith.extui %9 : i1 to i32
    %c0_i32_7 = arith.constant 0 : i32
    %11 = arith.cmpi ne, %10, %c0_i32_7 : i32
    scf.if %11 {
      %c0_8 = arith.constant 0 : index
      %c0_9 = arith.constant 0 : index
      %12 = vector.load %arg4[%c0_8, %c0_9] : memref<8x1xf32, #tpu.memory_space<vmem>>, vector<8x1xf32>
      %cst_10 = arith.constant 3.906250e-03 : f32
      %13 = vector.broadcast %cst_10 : f32 to vector<8x1xf32>
      %14 = arith.mulf %12, %13 : vector<8x1xf32>
      %c0_11 = arith.constant 0 : index
      %c0_12 = arith.constant 0 : index
      %15 = vector.load %arg3[%c0_11, %c0_12] : memref<8x1xf32, #tpu.memory_space<vmem>>, vector<8x1xf32>
      tpu.vector_store %arg3[%c0_11, %c0_12], %14 {strides = array<i32>} : memref<8x1xf32, #tpu.memory_space<vmem>>, vector<8x1xf32>,
    } else {
    }
    return
  }
  func.func @transform_0(%arg0: i32, %arg1: i32) -> (i32, i32) {
    %c0_i32 = arith.constant 0 : i32
    return %arg0, %arg1 : i32, i32
  }
  func.func @transform_1(%arg0: i32, %arg1: i32) -> (i32, i32) {
    %c0_i32 = arith.constant 0 : i32
    %c0_i32_0 = arith.constant 0 : i32
    return %arg0, %c0_i32 : i32, i32
  }
}

</mosaic_0001>

<bundles_post_ra>
// kernel: global_avg_pool2d.1
= control target key start
LH: loop header
LB: loop body
LE: loop exit
PB: predicated region body
PF: predicated region fallthrough
CT: control target
= control target key end

     0   :  { %vm12_vm0 = vcmask 7168   ;;  %v34_v2 = vmov 0.0   ;;  %s54_s0 = inlined_call_operand.vmem [shape: f32[8,256], index: 0, kind: input, shape index: {}]   ;;  %s55_s1 = inlined_call_operand.vmem [shape: f32[8,1], index: 1, kind: output, shape index: {}]  }
   0x1   :  { %v14_v0 = vld [vmem:[%s54_s0] sm:$0xff]  ;;  %v15_v1 = vld [vmem:[%s54_s0 + $0x8] sm:$0xff]  ;;  %13 = vst.msk [vmem:[#allocation2] sm:$0xff] %vm12_vm0, %v34_v2 }
   0x2   :  { %v17_v3 = vadd.f32 %v15_v1, %v14_v0 }
   0x4   :  { %18 = vadd.xlane.f32.xlu0 %v17_v3 }
   0x8   :  { %v16_v4 = vld [vmem:[#allocation2] sm:$0xff] }
  0x91   :  { %v19_v5 = vpop.xlane.xlu0 %18 }
  0x92   :  { %v20_v6 = vadd.f32 %v19_v5, %v16_v4 }
  0x94   :  { %22 = vst.msk [vmem:[#allocation2] sm:$0xff] %vm12_vm0, %v20_v6 }
  0x9b   :  { %v26_v7 = vld [vmem:[#allocation2] sm:$0xff] }
  0x9c   :  { %v27_v8 = vmul.f32 0.00390625, %v26_v7 }
  0x9e   :  { %28 = vst.msk [vmem:[%s55_s1] sm:$0xff] %vm12_vm0, %v27_v8 }

</bundles_post_ra>
